<compile_context>
chip_gen: v7x
topology: tpu7x:2x2x1
jax: 0.10.0
libtpu: 0.0.40
codegen_flags: <defaults>
</compile_context>

<pallas_src>
import functools
import math

import jax
import jax.numpy as jnp
from jax.experimental import pallas as pl
from jax.experimental.pallas import tpu as pltpu

# ------------------------- config (small synthetic shapes) -------------------------
B = 2          # batch (per view)
C = 4          # image channels
H = W = 8      # spatial
KH = KW = 3    # conv kernel
COUT = 8       # conv output channels
HIDDEN = 32    # projector hidden_dim
LATENT = 16    # latent_size
TEMP = 0.5     # temperature

HO, WO = H - KH + 1, W - KW + 1    # 6, 6
P = HO * WO                        # 36
REPR_DIM = COUT * P                # 288 = cnn_backbone.repr_dim
TAP_LANES = KH * KW * WO * C       # 216 lanes of one shifted-and-concatenated row
CV_LANES = WO * COUT               # 48 lanes of one conv output row
VB = 2 * B                         # both views stacked in the sublane axis

assert CV_LANES + 2 * HIDDEN + LATENT == 128   # packed biases = exactly one vreg
assert REPR_DIM == HO * CV_LANES


def _vmem():
    return pl.BlockSpec(memory_space=pltpu.MemorySpace.VMEM)


# ------------------------------- Pallas kernel --------------------------------------
def simclr_kernel(xcol_ref, wtap_ref, w1_ref, w23_ref, bias_ref, o_ref, conv_sc,
                  *, batch, inv_sqrt_temp):
    """Fused backbone + projector + L2-normalize + InfoNCE for BOTH views.

    xcol_ref : (HO, VB, TAP_LANES)  bf16  per-ho shifted/concatenated image rows
    wtap_ref : (TAP_LANES, CV_LANES) bf16 stacked block-diagonal per-tap conv weights
    w1_ref   : (REPR_DIM, HIDDEN)   bf16  projector layer 1 ((ho,wo,co) flatten order)
    w23_ref  : (HIDDEN, HIDDEN+LATENT) bf16  layers 2|3 packed along lanes
    bias_ref : (1, 128)             f32   conv(48) | b1(32) | b2(32) | b3(16)
    o_ref    : (1, 1)               f32   scalar InfoNCE loss
    conv_sc  : (VB, REPR_DIM)       f32   VMEM scratch for the flattened conv output
    """
    # --- unpack the lane-packed f32 biases (one vreg, loaded once) ----------------
    bconv = bias_ref[:, 0:CV_LANES]                                       # (1, 48)
    b1 = bias_ref[:, CV_LANES:CV_LANES + HIDDEN]                          # (1, 32)
    b2 = bias_ref[:, CV_LANES + HIDDEN:CV_LANES + 2 * HIDDEN]             # (1, 32)
    b3 = bias_ref[:, CV_LANES + 2 * HIDDEN:CV_LANES + 2 * HIDDEN + LATENT]  # (1, 16)

    # --- 3x3 valid conv: one 216-deep matmul per output row ho, ReLU'd rows written
    #     lane-dense into the flattened (ho, wo, co) representation scratch. --------
    wtap = wtap_ref[...]
    for ho in range(HO):
        r = jnp.dot(xcol_ref[ho], wtap,
                    preferred_element_type=jnp.float32)                  # (VB, 48)
        conv_sc[:, ho * CV_LANES:(ho + 1) * CV_LANES] = jnp.maximum(r + bconv, 0.0)

    # --- projector (bf16 MXU operands, f32 accumulate / elementwise) --------------
    h = conv_sc[...].astype(jnp.bfloat16)                                 # (VB, 288)
    h1 = jnp.maximum(
        jnp.dot(h, w1_ref[...], preferred_element_type=jnp.float32) + b1, 0.0)
    h2 = jnp.maximum(
        jnp.dot(h1.astype(jnp.bfloat16), w23_ref[:, 0:HIDDEN],
                preferred_element_type=jnp.float32) + b2, 0.0)
    z = jnp.dot(h2.astype(jnp.bfloat16), w23_ref[:, HIDDEN:HIDDEN + LATENT],
                preferred_element_type=jnp.float32) + b3                  # (VB, 16)

    # --- L2 normalize with the temperature folded in (all f32) --------------------
    nrm2 = jnp.sum(z * z, axis=1, keepdims=True)
    zn = z * (jax.lax.rsqrt(jnp.maximum(nrm2, jnp.float32(1e-24)))
              * jnp.float32(inv_sqrt_temp))                               # (VB, 16)

    # --- InfoNCE: diagonal-masked log-sum-exp minus positive-pair logits ----------
    n = 2 * batch
    sim = jnp.einsum('id,jd->ij', zn, zn,
                     preferred_element_type=jnp.float32)                  # (2B, 2B)
    row = jax.lax.broadcasted_iota(jnp.int32, (n, n), 0)
    col = jax.lax.broadcasted_iota(jnp.int32, (n, n), 1)
    sim_m = jnp.where(row == col, jnp.float32(-1e30), sim)
    m = jnp.max(sim_m, axis=1, keepdims=True)
    lse = m + jnp.log(jnp.sum(jnp.exp(sim_m - m), axis=1, keepdims=True))  # (2B, 1)
    pos = jnp.sum(zn[:batch] * zn[batch:], axis=1, keepdims=True)          # (B, 1)
    total = (jnp.sum(lse, axis=0, keepdims=True)
             - 2.0 * jnp.sum(pos, axis=0, keepdims=True))                  # (1, 1)
    o_ref[...] = total / jnp.float32(n)
    # TODO(synk): for realistic batch sizes this tail should become a gridded
    # online-LSE (flash-style) loss so the (2B)^2 sim matrix never materializes
    # (tile against v7x's 64 MiB VMEM); monolithic form is fine at B=2.


# ------------------------------- JAX glue / wrapper ----------------------------------
def simclr_forward(x1, x2, params, temp=TEMP):
    """SimCLR.forward(x1, x2) -> scalar InfoNCE loss (single fused pallas_call)."""
    wc, bc = params["conv"]                    # (KH*KW*C, COUT), (1, COUT)
    w1, b1, w2, b2, w3, b3 = params["proj"]

    # ---- layout plumbing (wrapper-side; free relative to kernel work) ------------
    # Both views stacked in the row axis; NCHW -> NHWC; per-ho shifted rows
    # concatenated along lanes in (tap, wo, c) order -> (HO, VB, 216) bf16.
    x = jnp.concatenate([x1, x2], axis=0)                  # (2B, C, H, W)
    x_nhwc = jnp.transpose(x, (0, 2, 3, 1))                # (2B, H, W, C)
    taps = [x_nhwc[:, di:di + HO, dj:dj + WO, :]
            for di in range(KH) for dj in range(KW)]       # 9 x (2B, HO, WO, C)
    xcol = jnp.stack(taps, axis=2).reshape(VB, HO, TAP_LANES)
    xcol = jnp.transpose(xcol, (1, 0, 2)).astype(jnp.bfloat16)   # (HO, VB, 216)

    # Conv weights -> stacked per-tap block-diagonal (216, 48): one matmul emits a
    # whole conv output row (all wo, co) lane-dense, contraction depth 216.
    wc3 = wc.reshape(KH * KW, C, COUT)
    eye = jnp.eye(WO, dtype=wc.dtype)
    wtap = jnp.einsum('ij,scd->sicjd', eye, wc3)
    wtap = wtap.reshape(TAP_LANES, CV_LANES).astype(jnp.bfloat16)

    # Projector layers 2|3 packed along lanes; biases packed into one 128-lane vreg.
    w23 = jnp.concatenate([w2, w3], axis=1).astype(jnp.bfloat16)        # (32, 48)
    bias = jnp.concatenate(
        [jnp.tile(bc.astype(jnp.float32), (1, WO)),                     # (1, 48)
         b1.astype(jnp.float32), b2.astype(jnp.float32),
         b3.astype(jnp.float32)], axis=1)                               # (1, 128)

    kernel = functools.partial(simclr_kernel, batch=B,
                               inv_sqrt_temp=1.0 / math.sqrt(temp))
    out = pl.pallas_call(
        kernel,
        out_shape=jax.ShapeDtypeStruct((1, 1), jnp.float32),
        in_specs=[_vmem()] * 5,
        out_specs=_vmem(),
        scratch_shapes=[pltpu.VMEM((VB, REPR_DIM), jnp.float32)],
        cost_estimate=pl.CostEstimate(flops=620_000, transcendentals=32,
                                      bytes_accessed=56 * 1024),
    )(xcol, wtap, w1.astype(jnp.bfloat16), w23, bias)
    return out[0, 0]


# ------------------------------- reference (plain JAX) ------------------------------
def _im2col(x_nhwc, kh, kw):
    b, h, w, c = x_nhwc.shape
    ho, wo = h - kh + 1, w - kw + 1
    cols = []
    for di in range(kh):
        for dj in range(kw):
            cols.append(x_nhwc[:, di:di + ho, dj:dj + wo, :])
    p = jnp.stack(cols, axis=3)                      # (B, Ho, Wo, kh*kw, C)
    return p.reshape(b, ho * wo, kh * kw * c)


def _ref_info_nce(z1, z2, temp):
    n1 = z1 / jnp.maximum(jnp.linalg.norm(z1, axis=1, keepdims=True), 1e-12)
    n2 = z2 / jnp.maximum(jnp.linalg.norm(z2, axis=1, keepdims=True), 1e-12)
    z = jnp.concatenate([n1, n2], axis=0)
    sim = z @ z.T / temp
    n = sim.shape[0]
    mask = ~jnp.eye(n, dtype=bool)
    logits = sim[mask].reshape(n, n - 1)
    bsz = z1.shape[0]
    labels = jnp.concatenate([jnp.arange(bsz) + bsz - 1, jnp.arange(bsz)])
    lse = jax.scipy.special.logsumexp(logits, axis=1)
    return jnp.mean(lse - logits[jnp.arange(n), labels])


def _ref_forward(x1, x2, params, temp=TEMP, mxu_dtype=None):
    """Plain-JAX reference.  mxu_dtype=jnp.bfloat16 mimics the kernel's MXU operand
    precision (operands rounded to bf16, accumulation/elementwise f32)."""
    wc, bc = params["conv"]
    w1, b1, w2, b2, w3, b3 = params["proj"]

    def rnd(a):
        return a if mxu_dtype is None else a.astype(mxu_dtype).astype(jnp.float32)

    def backbone(x):
        xh = jnp.transpose(x, (0, 2, 3, 1))
        p = _im2col(xh, KH, KW).reshape(-1, KH * KW * C)
        conv = jnp.maximum(rnd(p) @ rnd(wc) + bc, 0.0)
        return conv.reshape(x.shape[0], -1)

    def proj(h):
        h1 = jnp.maximum(rnd(h) @ rnd(w1) + b1, 0.0)
        h2 = jnp.maximum(rnd(h1) @ rnd(w2) + b2, 0.0)
        return rnd(h2) @ rnd(w3) + b3

    return _ref_info_nce(proj(backbone(x1)), proj(backbone(x2)), temp)


# TODO(synk): Transform (torchvision random augmentations) and RMS have no Pallas
# equivalent and are not part of the forward(x1, x2) compute path; omitted.

# ----------------------------------- main --------------------------------------------
if __name__ == "__main__":
    key = jax.random.PRNGKey(0)
    keys = jax.random.split(key, 10)

    x1 = jax.random.normal(keys[0], (B, C, H, W), jnp.float32)
    x2 = jax.random.normal(keys[1], (B, C, H, W), jnp.float32)

    K = KH * KW * C
    params = {
        "conv": (
            0.1 * jax.random.normal(keys[2], (K, COUT), jnp.float32),
            0.01 * jax.random.normal(keys[3], (1, COUT), jnp.float32),
        ),
        "proj": (
            0.05 * jax.random.normal(keys[4], (REPR_DIM, HIDDEN), jnp.float32),
            jnp.zeros((1, HIDDEN), jnp.float32),
            0.1 * jax.random.normal(keys[5], (HIDDEN, HIDDEN), jnp.float32),
            jnp.zeros((1, HIDDEN), jnp.float32),
            0.1 * jax.random.normal(keys[6], (HIDDEN, LATENT), jnp.float32),
            jnp.zeros((1, LATENT), jnp.float32),
        ),
    }

    loss = simclr_forward(x1, x2, params)
    jax.block_until_ready(loss)

    # Tight check vs. a reference that mimics the kernel's bf16 MXU operands.
    ref_mixed = _ref_forward(x1, x2, params, mxu_dtype=jnp.bfloat16)
    assert jnp.abs(loss - ref_mixed) < 1e-3, (loss, ref_mixed)
    # Loose sanity check vs. the full-f32 reference (only bf16 operand rounding
    # separates the two).
    ref_f32 = _ref_forward(x1, x2, params)
    assert jnp.abs(loss - ref_f32) < 1e-1, (loss, ref_f32)

    print("KERNEL_OK")
</pallas_src>

<mosaic_0001>
module attributes {stable_mosaic.version = 11 : i64} {
  func.func @simclr_kernel(%arg0: memref<6x4x216xbf16, #tpu.memory_space<vmem>>, %arg1: memref<216x48xbf16, #tpu.memory_space<vmem>>, %arg2: memref<288x32xbf16, #tpu.memory_space<vmem>>, %arg3: memref<32x48xbf16, #tpu.memory_space<vmem>>, %arg4: memref<1x128xf32, #tpu.memory_space<vmem>>, %arg5: memref<1x1xf32, #tpu.memory_space<vmem>>, %arg6: memref<4x288xf32, #tpu.memory_space<vmem>>) attributes {dimension_semantics = [], scalar_prefetch = 0 : i64, scratch_operands = 1 : i64, tpu.core_type = #tpu.core_type<tc>} {
    %c0 = arith.constant 0 : index
    %c0_0 = arith.constant 0 : index
    %0 = vector.load %arg4[%c0, %c0_0] : memref<1x128xf32, #tpu.memory_space<vmem>>, vector<1x48xf32>
    %c0_1 = arith.constant 0 : index
    %c48 = arith.constant 48 : index
    %1 = vector.load %arg4[%c0_1, %c48] : memref<1x128xf32, #tpu.memory_space<vmem>>, vector<1x32xf32>
    %c0_2 = arith.constant 0 : index
    %c80 = arith.constant 80 : index
    %2 = vector.load %arg4[%c0_2, %c80] : memref<1x128xf32, #tpu.memory_space<vmem>>, vector<1x32xf32>
    %c0_3 = arith.constant 0 : index
    %c112 = arith.constant 112 : index
    %3 = vector.load %arg4[%c0_3, %c112] : memref<1x128xf32, #tpu.memory_space<vmem>>, vector<1x16xf32>
    %c0_4 = arith.constant 0 : index
    %c0_5 = arith.constant 0 : index
    %4 = vector.load %arg1[%c0_4, %c0_5] : memref<216x48xbf16, #tpu.memory_space<vmem>>, vector<216x48xbf16>
    %c0_6 = arith.constant 0 : index
    %c0_7 = arith.constant 0 : index
    %c0_8 = arith.constant 0 : index
    %5 = vector.load %arg0[%c0_6, %c0_7, %c0_8] : memref<6x4x216xbf16, #tpu.memory_space<vmem>>, vector<1x4x216xbf16>
    %6 = vector.shape_cast %5 : vector<1x4x216xbf16> to vector<4x216xbf16>
    %cst = arith.constant dense<0.000000e+00> : vector<4x48xf32>
    %7 = tpu.matmul %6, %4, %cst {dimension_numbers = #tpu.dot_dimension_numbers<[1], [0], [0], [1], [0, 0, 1, 1], [], []>} : vector<4x216xbf16>, vector<216x48xbf16>, vector<4x48xf32> -> vector<4x48xf32>
    %8 = vector.broadcast %0 : vector<1x48xf32> to vector<4x48xf32>
    %9 = arith.addf %7, %8 : vector<4x48xf32>
    %cst_9 = arith.constant 0.000000e+00 : f32
    %10 = vector.broadcast %cst_9 : f32 to vector<4x48xf32>
    %11 = arith.maximumf %9, %10 : vector<4x48xf32>
    %c0_10 = arith.constant 0 : index
    %c0_11 = arith.constant 0 : index
    %12 = vector.load %arg6[%c0_10, %c0_11] : memref<4x288xf32, #tpu.memory_space<vmem>>, vector<4x48xf32>
    tpu.vector_store %arg6[%c0_10, %c0_11], %11 {strides = array<i32>} : memref<4x288xf32, #tpu.memory_space<vmem>>, vector<4x48xf32>,
    %c1 = arith.constant 1 : index
    %c0_12 = arith.constant 0 : index
    %c0_13 = arith.constant 0 : index
    %13 = vector.load %arg0[%c1, %c0_12, %c0_13] : memref<6x4x216xbf16, #tpu.memory_space<vmem>>, vector<1x4x216xbf16>
    %14 = vector.shape_cast %13 : vector<1x4x216xbf16> to vector<4x216xbf16>
    %cst_14 = arith.constant dense<0.000000e+00> : vector<4x48xf32>
    %15 = tpu.matmul %14, %4, %cst_14 {dimension_numbers = #tpu.dot_dimension_numbers<[1], [0], [0], [1], [0, 0, 1, 1], [], []>} : vector<4x216xbf16>, vector<216x48xbf16>, vector<4x48xf32> -> vector<4x48xf32>
    %16 = vector.broadcast %0 : vector<1x48xf32> to vector<4x48xf32>
    %17 = arith.addf %15, %16 : vector<4x48xf32>
    %cst_15 = arith.constant 0.000000e+00 : f32
    %18 = vector.broadcast %cst_15 : f32 to vector<4x48xf32>
    %19 = arith.maximumf %17, %18 : vector<4x48xf32>
    %c0_16 = arith.constant 0 : index
    %c48_17 = arith.constant 48 : index
    %20 = vector.load %arg6[%c0_16, %c48_17] : memref<4x288xf32, #tpu.memory_space<vmem>>, vector<4x48xf32>
    tpu.vector_store %arg6[%c0_16, %c48_17], %19 {strides = array<i32>} : memref<4x288xf32, #tpu.memory_space<vmem>>, vector<4x48xf32>,
    %c2 = arith.constant 2 : index
    %c0_18 = arith.constant 0 : index
    %c0_19 = arith.constant 0 : index
    %21 = vector.load %arg0[%c2, %c0_18, %c0_19] : memref<6x4x216xbf16, #tpu.memory_space<vmem>>, vector<1x4x216xbf16>
    %22 = vector.shape_cast %21 : vector<1x4x216xbf16> to vector<4x216xbf16>
    %cst_20 = arith.constant dense<0.000000e+00> : vector<4x48xf32>
    %23 = tpu.matmul %22, %4, %cst_20 {dimension_numbers = #tpu.dot_dimension_numbers<[1], [0], [0], [1], [0, 0, 1, 1], [], []>} : vector<4x216xbf16>, vector<216x48xbf16>, vector<4x48xf32> -> vector<4x48xf32>
    %24 = vector.broadcast %0 : vector<1x48xf32> to vector<4x48xf32>
    %25 = arith.addf %23, %24 : vector<4x48xf32>
    %cst_21 = arith.constant 0.000000e+00 : f32
    %26 = vector.broadcast %cst_21 : f32 to vector<4x48xf32>
    %27 = arith.maximumf %25, %26 : vector<4x48xf32>
    %c0_22 = arith.constant 0 : index
    %c96 = arith.constant 96 : index
    %28 = vector.load %arg6[%c0_22, %c96] : memref<4x288xf32, #tpu.memory_space<vmem>>, vector<4x48xf32>
    tpu.vector_store %arg6[%c0_22, %c96], %27 {strides = array<i32>} : memref<4x288xf32, #tpu.memory_space<vmem>>, vector<4x48xf32>,
    %c3 = arith.constant 3 : index
    %c0_23 = arith.constant 0 : index
    %c0_24 = arith.constant 0 : index
    %29 = vector.load %arg0[%c3, %c0_23, %c0_24] : memref<6x4x216xbf16, #tpu.memory_space<vmem>>, vector<1x4x216xbf16>
    %30 = vector.shape_cast %29 : vector<1x4x216xbf16> to vector<4x216xbf16>
    %cst_25 = arith.constant dense<0.000000e+00> : vector<4x48xf32>
    %31 = tpu.matmul %30, %4, %cst_25 {dimension_numbers = #tpu.dot_dimension_numbers<[1], [0], [0], [1], [0, 0, 1, 1], [], []>} : vector<4x216xbf16>, vector<216x48xbf16>, vector<4x48xf32> -> vector<4x48xf32>
    %32 = vector.broadcast %0 : vector<1x48xf32> to vector<4x48xf32>
    %33 = arith.addf %31, %32 : vector<4x48xf32>
    %cst_26 = arith.constant 0.000000e+00 : f32
    %34 = vector.broadcast %cst_26 : f32 to vector<4x48xf32>
    %35 = arith.maximumf %33, %34 : vector<4x48xf32>
    %c0_27 = arith.constant 0 : index
    %c144 = arith.constant 144 : index
    %36 = vector.load %arg6[%c0_27, %c144] : memref<4x288xf32, #tpu.memory_space<vmem>>, vector<4x48xf32>
    tpu.vector_store %arg6[%c0_27, %c144], %35 {strides = array<i32>} : memref<4x288xf32, #tpu.memory_space<vmem>>, vector<4x48xf32>,
    %c4 = arith.constant 4 : index
    %c0_28 = arith.constant 0 : index
    %c0_29 = arith.constant 0 : index
    %37 = vector.load %arg0[%c4, %c0_28, %c0_29] : memref<6x4x216xbf16, #tpu.memory_space<vmem>>, vector<1x4x216xbf16>
    %38 = vector.shape_cast %37 : vector<1x4x216xbf16> to vector<4x216xbf16>
    %cst_30 = arith.constant dense<0.000000e+00> : vector<4x48xf32>
    %39 = tpu.matmul %38, %4, %cst_30 {dimension_numbers = #tpu.dot_dimension_numbers<[1], [0], [0], [1], [0, 0, 1, 1], [], []>} : vector<4x216xbf16>, vector<216x48xbf16>, vector<4x48xf32> -> vector<4x48xf32>
    %40 = vector.broadcast %0 : vector<1x48xf32> to vector<4x48xf32>
    %41 = arith.addf %39, %40 : vector<4x48xf32>
    %cst_31 = arith.constant 0.000000e+00 : f32
    %42 = vector.broadcast %cst_31 : f32 to vector<4x48xf32>
    %43 = arith.maximumf %41, %42 : vector<4x48xf32>
    %c0_32 = arith.constant 0 : index
    %c192 = arith.constant 192 : index
    %44 = vector.load %arg6[%c0_32, %c192] : memref<4x288xf32, #tpu.memory_space<vmem>>, vector<4x48xf32>
    tpu.vector_store %arg6[%c0_32, %c192], %43 {strides = array<i32>} : memref<4x288xf32, #tpu.memory_space<vmem>>, vector<4x48xf32>,
    %c5 = arith.constant 5 : index
    %c0_33 = arith.constant 0 : index
    %c0_34 = arith.constant 0 : index
    %45 = vector.load %arg0[%c5, %c0_33, %c0_34] : memref<6x4x216xbf16, #tpu.memory_space<vmem>>, vector<1x4x216xbf16>
    %46 = vector.shape_cast %45 : vector<1x4x216xbf16> to vector<4x216xbf16>
    %cst_35 = arith.constant dense<0.000000e+00> : vector<4x48xf32>
    %47 = tpu.matmul %46, %4, %cst_35 {dimension_numbers = #tpu.dot_dimension_numbers<[1], [0], [0], [1], [0, 0, 1, 1], [], []>} : vector<4x216xbf16>, vector<216x48xbf16>, vector<4x48xf32> -> vector<4x48xf32>
    %48 = vector.broadcast %0 : vector<1x48xf32> to vector<4x48xf32>
    %49 = arith.addf %47, %48 : vector<4x48xf32>
    %cst_36 = arith.constant 0.000000e+00 : f32
    %50 = vector.broadcast %cst_36 : f32 to vector<4x48xf32>
    %51 = arith.maximumf %49, %50 : vector<4x48xf32>
    %c0_37 = arith.constant 0 : index
    %c240 = arith.constant 240 : index
    %52 = vector.load %arg6[%c0_37, %c240] : memref<4x288xf32, #tpu.memory_space<vmem>>, vector<4x48xf32>
    tpu.vector_store %arg6[%c0_37, %c240], %51 {strides = array<i32>} : memref<4x288xf32, #tpu.memory_space<vmem>>, vector<4x48xf32>,
    %c0_38 = arith.constant 0 : index
    %c0_39 = arith.constant 0 : index
    %53 = vector.load %arg6[%c0_38, %c0_39] : memref<4x288xf32, #tpu.memory_space<vmem>>, vector<4x288xf32>
    %54 = arith.truncf %53 : vector<4x288xf32> to vector<4x288xbf16>
    %c0_40 = arith.constant 0 : index
    %c0_41 = arith.constant 0 : index
    %55 = vector.load %arg2[%c0_40, %c0_41] : memref<288x32xbf16, #tpu.memory_space<vmem>>, vector<288x32xbf16>
    %cst_42 = arith.constant dense<0.000000e+00> : vector<4x32xf32>
    %56 = tpu.matmul %54, %55, %cst_42 {dimension_numbers = #tpu.dot_dimension_numbers<[1], [0], [0], [1], [0, 0, 1, 1], [], []>} : vector<4x288xbf16>, vector<288x32xbf16>, vector<4x32xf32> -> vector<4x32xf32>
    %57 = vector.broadcast %1 : vector<1x32xf32> to vector<4x32xf32>
    %58 = arith.addf %56, %57 : vector<4x32xf32>
    %cst_43 = arith.constant 0.000000e+00 : f32
    %59 = vector.broadcast %cst_43 : f32 to vector<4x32xf32>
    %60 = arith.maximumf %58, %59 : vector<4x32xf32>
    %61 = arith.truncf %60 : vector<4x32xf32> to vector<4x32xbf16>
    %c0_44 = arith.constant 0 : index
    %c0_45 = arith.constant 0 : index
    %62 = vector.load %arg3[%c0_44, %c0_45] : memref<32x48xbf16, #tpu.memory_space<vmem>>, vector<32x32xbf16>
    %cst_46 = arith.constant dense<0.000000e+00> : vector<4x32xf32>
    %63 = tpu.matmul %61, %62, %cst_46 {dimension_numbers = #tpu.dot_dimension_numbers<[1], [0], [0], [1], [0, 0, 1, 1], [], []>} : vector<4x32xbf16>, vector<32x32xbf16>, vector<4x32xf32> -> vector<4x32xf32>
    %64 = vector.broadcast %2 : vector<1x32xf32> to vector<4x32xf32>
    %65 = arith.addf %63, %64 : vector<4x32xf32>
    %cst_47 = arith.constant 0.000000e+00 : f32
    %66 = vector.broadcast %cst_47 : f32 to vector<4x32xf32>
    %67 = arith.maximumf %65, %66 : vector<4x32xf32>
    %68 = arith.truncf %67 : vector<4x32xf32> to vector<4x32xbf16>
    %c0_48 = arith.constant 0 : index
    %c32 = arith.constant 32 : index
    %69 = vector.load %arg3[%c0_48, %c32] : memref<32x48xbf16, #tpu.memory_space<vmem>>, vector<32x16xbf16>
    %cst_49 = arith.constant dense<0.000000e+00> : vector<4x16xf32>
    %70 = tpu.matmul %68, %69, %cst_49 {dimension_numbers = #tpu.dot_dimension_numbers<[1], [0], [0], [1], [0, 0, 1, 1], [], []>} : vector<4x32xbf16>, vector<32x16xbf16>, vector<4x16xf32> -> vector<4x16xf32>
    %71 = vector.broadcast %3 : vector<1x16xf32> to vector<4x16xf32>
    %72 = arith.addf %70, %71 : vector<4x16xf32>
    %73 = arith.mulf %72, %72 : vector<4x16xf32>
    %cst_50 = arith.constant dense<0.000000e+00> : vector<4xf32>
    %74 = vector.multi_reduction <add>, %73, %cst_50 [1] : vector<4x16xf32> to vector<4xf32>
    %75 = vector.shape_cast %74 : vector<4xf32> to vector<4x1xf32>
    %cst_51 = arith.constant 1.000000e-24 : f32
    %76 = vector.broadcast %cst_51 : f32 to vector<4x1xf32>
    %77 = arith.maximumf %75, %76 : vector<4x1xf32>
    %78 = math.rsqrt %77 : vector<4x1xf32>
    %cst_52 = arith.constant 1.41421354 : f32
    %79 = vector.broadcast %cst_52 : f32 to vector<4x1xf32>
    %80 = arith.mulf %78, %79 : vector<4x1xf32>
    %81 = vector.broadcast %80 : vector<4x1xf32> to vector<4x16xf32>
    %82 = arith.mulf %72, %81 : vector<4x16xf32>
    "tpu.trace_start"() <{level = 10 : i32, message = "id,jd->ij"}> : () -> ()
    %cst_53 = arith.constant dense<0.000000e+00> : vector<4x4xf32>
    %83 = tpu.matmul %82, %82, %cst_53 {dimension_numbers = #tpu.dot_dimension_numbers<[1], [1], [0], [0], [0, 0, 1, 0], [], []>} : vector<4x16xf32>, vector<4x16xf32>, vector<4x4xf32> -> vector<4x4xf32>
    "tpu.trace_stop"() : () -> ()
    %84 = tpu.iota {dimensions = array<i32: 0>} : vector<4x4xi32>
    %85 = tpu.iota {dimensions = array<i32: 1>} : vector<4x4xi32>
    %86 = arith.cmpi eq, %84, %85 : vector<4x4xi32>
    %cst_54 = arith.constant -1.000000e+30 : f32
    %87 = vector.broadcast %cst_54 : f32 to vector<4x4xf32>
    %88 = arith.select %86, %87, %83 : vector<4x4xi1>, vector<4x4xf32>
    %cst_55 = arith.constant dense<0xFF800000> : vector<4xf32>
    %89 = vector.multi_reduction <maximumf>, %88, %cst_55 [1] : vector<4x4xf32> to vector<4xf32>
    %90 = vector.shape_cast %89 : vector<4xf32> to vector<4x1xf32>
    %91 = vector.broadcast %90 : vector<4x1xf32> to vector<4x4xf32>
    %92 = arith.subf %88, %91 : vector<4x4xf32>
    %93 = math.exp %92 : vector<4x4xf32>
    %cst_56 = arith.constant dense<0.000000e+00> : vector<4xf32>
    %94 = vector.multi_reduction <add>, %93, %cst_56 [1] : vector<4x4xf32> to vector<4xf32>
    %95 = vector.shape_cast %94 : vector<4xf32> to vector<4x1xf32>
    %96 = math.log %95 : vector<4x1xf32>
    %97 = arith.addf %90, %96 : vector<4x1xf32>
    %98 = vector.extract_strided_slice %82 {offsets = [0, 0], sizes = [2, 16], strides = [1, 1]} : vector<4x16xf32> to vector<2x16xf32>
    %99 = vector.extract_strided_slice %82 {offsets = [2, 0], sizes = [2, 16], strides = [1, 1]} : vector<4x16xf32> to vector<2x16xf32>
    %100 = arith.mulf %98, %99 : vector<2x16xf32>
    %cst_57 = arith.constant dense<0.000000e+00> : vector<2xf32>
    %101 = vector.multi_reduction <add>, %100, %cst_57 [1] : vector<2x16xf32> to vector<2xf32>
    %102 = vector.shape_cast %101 : vector<2xf32> to vector<2x1xf32>
    %cst_58 = arith.constant dense<0.000000e+00> : vector<1xf32>
    %103 = vector.multi_reduction <add>, %97, %cst_58 [0] : vector<4x1xf32> to vector<1xf32>
    %104 = vector.shape_cast %103 : vector<1xf32> to vector<1x1xf32>
    %cst_59 = arith.constant dense<0.000000e+00> : vector<1xf32>
    %105 = vector.multi_reduction <add>, %102, %cst_59 [0] : vector<2x1xf32> to vector<1xf32>
    %106 = vector.shape_cast %105 : vector<1xf32> to vector<1x1xf32>
    %cst_60 = arith.constant 2.000000e+00 : f32
    %107 = vector.broadcast %cst_60 : f32 to vector<1x1xf32>
    %108 = arith.mulf %107, %106 : vector<1x1xf32>
    %109 = arith.subf %104, %108 : vector<1x1xf32>
    %cst_61 = arith.constant 4.000000e+00 : f32
    %110 = vector.broadcast %cst_61 : f32 to vector<1x1xf32>
    %111 = arith.divf %109, %110 : vector<1x1xf32>
    %c0_62 = arith.constant 0 : index
    %c0_63 = arith.constant 0 : index
    %112 = vector.load %arg5[%c0_62, %c0_63] : memref<1x1xf32, #tpu.memory_space<vmem>>, vector<1x1xf32>
    tpu.vector_store %arg5[%c0_62, %c0_63], %111 {strides = array<i32>} : memref<1x1xf32, #tpu.memory_space<vmem>>, vector<1x1xf32>,
    return
  }
}

</mosaic_0001>

<bundles_post_ra>
// kernel: tpu_custom_call.1
= control target key start
LH: loop header
LB: loop body
LE: loop exit
PB: predicated region body
PF: predicated region fallthrough
CT: control target
= control target key end

     0   :  { %v1214_v1 = vmov 0   ;;  %vm148_vm0 = vcmask 719872   ;;  %s1652_s0 = inlined_call_operand.vmem [shape: bf16[6,4,216], index: 0, kind: input, shape index: {}]   ;;  %s1653_s1 = inlined_call_operand.vmem [shape: bf16[216,48], index: 1, kind: input, shape index: {}]   ;;  %s1654_s2 = inlined_call_operand.vmem [shape: bf16[288,32], index: 2, kind: input, shape index: {}]   ;;  %s1655_s3 = inlined_call_operand.vmem [shape: bf16[32,48], index: 3, kind: input, shape index: {}]   ;;  %s1656_s4 = inlined_call_operand.vmem [shape: f32[1,128], index: 4, kind: input, shape index: {}]   ;;  %s1657_s5 = inlined_call_operand.hbm [shape: f32[1,1], index: 5, kind: output, shape index: {}]  }
   0x1   :  { %v1257_v0 = vld [vmem:[%s1653_s1] sm:$0xff]   ;;  %156 = vmatprep.subr.bf16.mxu0 %v1214_v1  ;;  %214 = vmatprep.subr.bf16.mxu1 %v1214_v1  ;;  %v1266_v2 = vld [vmem:[%s1653_s1 + $0x8] sm:$0xff]   ;;  %v1275_v3 = vld [vmem:[%s1653_s1 + $0x10] sm:$0xff]  }
   0x2   :  { %157 = vmatpush1.bf16.msra.mxu0 %v1257_v0  ;;  %215 = vmatpush1.bf16.msra.mxu1 %v1257_v0  ;;  %v1284_v4 = vld [vmem:[%s1653_s1 + $0x18] sm:$0xff]   ;;  %v1291_v5 = vld [vmem:[%s1653_s1 + $0x20] sm:$0xff]   ;;  %v1310_v10 = vld [vmem:[%s1653_s1 + $0x28] sm:$0xff]  }
   0x3   :  { %158 = vmatprep.subr.bf16.mxu0 %v1214_v1  ;;  %216 = vmatprep.subr.bf16.mxu1 %v1214_v1  ;;  %v1298_v6 = vld.sshfl [vmem:[%s1652_s0 + $0x4] sm:$0x33 pattern:$0x76325410]  ;;  %v1320_v11 = vld [vmem:[%s1653_s1 + $0x30] sm:$0xff]   ;;  %v1330_v12 = vld [vmem:[%s1653_s1 + $0x38] sm:$0xff]  }
   0x4   :  { %v209_v7 = vcombine.high %v1298_v6, %v1298_v6  ;;  %v1021_v8 = vld.sshfl [vmem:[%s1652_s0] sm:$0x33 pattern:$0x76325410] }
   0x5   :  { %v65_v9 = vcombine.high %v1021_v8, %v1021_v8  ;;  %v1341_v13 = vld [vmem:[%s1653_s1 + $0x40] sm:$0xff]  }
   0x6   :  { %159 = vmatpush1.bf16.msra.mxu0 %v1266_v2  ;;  %217 = vmatpush1.bf16.msra.mxu1 %v1266_v2 }
   0x7   :  { %160 = vmatprep.subr.bf16.mxu0 %v1214_v1  ;;  %218 = vmatprep.subr.bf16.mxu1 %v1214_v1 }
   0x8   :  { %1039 = vmatprep.mubr.msk.bf16.mxu1 %vm148_vm0, %v209_v7  ;;  %1036 = vmatprep.mubr.msk.bf16.mxu0 %vm148_vm0, %v65_v9 }
   0xa   :  { %161 = vmatpush1.bf16.msra.mxu0 %v1275_v3  ;;  %219 = vmatpush1.bf16.msra.mxu1 %v1275_v3 }
   0xb   :  { %162 = vmatprep.subr.bf16.mxu0 %v1214_v1  ;;  %220 = vmatprep.subr.bf16.mxu1 %v1214_v1 }
   0xe   :  { %163 = vmatpush1.bf16.msra.mxu0 %v1284_v4  ;;  %221 = vmatpush1.bf16.msra.mxu1 %v1284_v4 }
   0xf   :  { %164 = vmatprep.subr.bf16.mxu0 %v1214_v1  ;;  %222 = vmatprep.subr.bf16.mxu1 %v1214_v1 }
  0x12   :  { %165 = vmatpush1.bf16.msra.mxu0 %v1291_v5  ;;  %223 = vmatpush1.bf16.msra.mxu1 %v1291_v5 }
  0x13   :  { %166 = vmatprep.subr.bf16.mxu0 %v1214_v1  ;;  %224 = vmatprep.subr.bf16.mxu1 %v1214_v1 }
  0x16   :  { %167 = vmatpush1.bf16.msra.mxu0 %v1310_v10  ;;  %225 = vmatpush1.bf16.msra.mxu1 %v1310_v10 }
  0x17   :  { %168 = vmatprep.subr.bf16.mxu0 %v1214_v1  ;;  %226 = vmatprep.subr.bf16.mxu1 %v1214_v1 }
  0x1a   :  { %169 = vmatpush1.bf16.msra.mxu0 %v1320_v11  ;;  %227 = vmatpush1.bf16.msra.mxu1 %v1320_v11 }
  0x1b   :  { %170 = vmatprep.subr.bf16.mxu0 %v1214_v1  ;;  %228 = vmatprep.subr.bf16.mxu1 %v1214_v1 }
  0x1e   :  { %171 = vmatpush1.bf16.msra.mxu0 %v1330_v12  ;;  %229 = vmatpush1.bf16.msra.mxu1 %v1330_v12 }
  0x1f   :  { %10 = vsyncpa [#allocation4], 0  ;;  %172 = vmatprep.subr.bf16.mxu0 %v1214_v1  ;;  %230 = vmatprep.subr.bf16.mxu1 %v1214_v1  ;;  %v1350_v14 = vld [vmem:[%s1653_s1 + $0x48] sm:$0xff]   ;;  %v1359_v15 = vld [vmem:[%s1653_s1 + $0x50] sm:$0xff]   ;;  %vm152_vm1 = vcmask 1043456   ;;  %vm197_vm2 = vcmask 388096  }
  0x20   :  { %v1368_v16 = vld [vmem:[%s1653_s1 + $0x58] sm:$0xff]   ;;  %v1377_v17 = vld [vmem:[%s1653_s1 + $0x60] sm:$0xff]   ;;  %v1162_v18 = vld [vmem:[%s1653_s1 + $0x68] ss:$0 sps:$4 sm:$0xff]   ;;  %s1215_s21 = smov 96   ;;  %s1216_s22 = smov 48  }
  0x21   :  { %v1389_v19 = vsel %vm152_vm1, %v1162_v18, 0  ;;  %v1394_v20 = vld.sshfl [vmem:[%s1652_s0 + $0x8] sm:$0x33 pattern:$0x76325410]  ;;  %v1163_v39 = vld [vmem:[%s1654_s2 + $0x40] sm:$0xff]  }
  0x22   :  { %173 = vmatpush1.bf16.msra.mxu0 %v1341_v13  ;;  %231 = vmatpush1.bf16.msra.mxu1 %v1341_v13  ;;  %v1399_v21 = vld.sshfl [vmem:[%s1652_s0 + $0xc] sm:$0x33 pattern:$0x76325410]  ;;  %v271_v22 = vcombine.high %v1394_v20, %v1394_v20  ;;  %v1545_v28 = vld [vmem:[%s1656_s4] ss:$0 sm:$0xff] }
  0x23   :  { %174 = vmatprep.subr.bf16.mxu0 %v1214_v1  ;;  %232 = vmatprep.subr.bf16.mxu1 %v1214_v1  ;;  %v338_v23 = vcombine.high %v1399_v21, %v1399_v21  ;;  %v1467_v24 = vld.sshfl [vmem:[%s1652_s0 + $0x14] sm:$0x33 pattern:$0x76325410]  ;;  %v1164_v40 = vld [vmem:[%s1654_s2] sm:$0xff]   ;;  %v1165_v41 = vld [vmem:[%s1654_s2 + $0x48] sm:$0xff]  }
  0x24   :  { %v1472_v25 = vld.sshfl [vmem:[%s1652_s0 + $0x10] sm:$0x33 pattern:$0x76325410]  ;;  %v462_v26 = vcombine.high %v1467_v24, %v1467_v24  ;;  %v1166_v42 = vld [vmem:[%s1654_s2 + $0x8] sm:$0xff]   ;;  %v1169_v56 = vld [vmem:[%s1654_s2 + $0x58] sm:$0xff]  }
  0x25   :  { %v400_v27 = vcombine.high %v1472_v25, %v1472_v25  ;;  %v1167_v45 = vld [vmem:[%s1654_s2 + $0x50] sm:$0xff]   ;;  %v1170_v58 = vld [vmem:[%s1654_s2 + $0x18] sm:$0xff]   ;;  %v1171_v59 = vld [vmem:[%s1654_s2 + $0x60] sm:$0xff]   ;;  %vm1218_vm3 = vmmov 0   ;;  %s1219_s17 = smov 112   ;;  %s1220_s18 = smov 64  }
  0x26   :  { %175 = vmatpush1.bf16.msra.mxu0 %v1350_v14  ;;  %233 = vmatpush1.bf16.msra.mxu1 %v1350_v14  ;;  %v1168_v55 = vld [vmem:[%s1654_s2 + $0x10] sm:$0xff]   ;;  %v1172_v60 = vld [vmem:[%s1654_s2 + $0x20] sm:$0xff]   ;;  %v1173_v61 = vld [vmem:[%s1654_s2 + $0x68] sm:$0xff]   ;;  %s1221_s19 = smov 16   ;;  %s1222_s20 = smov 80   ;;  %vm321_vm4 = vcmask 785408  }
  0x27   :  { %176 = vmatprep.subr.bf16.mxu0 %v1214_v1  ;;  %234 = vmatprep.subr.bf16.mxu1 %v1214_v1  ;;  %v1174_v62 = vld [vmem:[%s1654_s2 + $0x28] sm:$0xff]   ;;  %v1175_v63 = vld [vmem:[%s1654_s2 + $0x80] sm:$0xff]   ;;  %v1180_v18 = vld [vmem:[%s1654_s2 + $0x38] sm:$0xff]   ;;  %vm324_vm5 = vcmask 1044224   ;;  %vm325_vm6 = vcmask 130052   ;;  %vm259_vm7 = vcmask 781696  }
  0x28   :  { %vm326_vm8 = vmor %vm325_vm6, %vm324_vm5  ;;  %vm515_vm9 = vcmask 1044352   ;;  %vm516_vm10 = vcmask 261124   ;;  %vm388_vm11 = vcmask 519296   ;;  %vm512_vm12 = vcmask 916480  }
  0x29   :  { %vm450_vm13 = vcmask 912896   ;;  %vm517_vm14 = vmor %vm516_vm10, %vm515_vm9  ;;  %vm674_vm15 = vcmask 261120   ;;  %vm981_vm5 = vcmask 123904   ;;  %vm992_vm6 = vcmask 1041408  }
  0x2a   :  { %177 = vmatpush1.bf16.msra.mxu0 %v1359_v15  ;;  %235 = vmatpush1.bf16.msra.mxu1 %v1359_v15 }
  0x2b   :  { %178 = vmatprep.subr.bf16.mxu0 %v1214_v1  ;;  %236 = vmatprep.subr.bf16.mxu1 %v1214_v1 }
  0x2e   :  { %179 = vmatpush1.bf16.msra.mxu0 %v1368_v16  ;;  %237 = vmatpush1.bf16.msra.mxu1 %v1368_v16 }
  0x2f   :  { %180 = vmatprep.subr.bf16.mxu0 %v1214_v1  ;;  %238 = vmatprep.subr.bf16.mxu1 %v1214_v1 }
  0x32   :  { %181 = vmatpush1.bf16.msra.mxu0 %v1377_v17  ;;  %239 = vmatpush1.bf16.msra.mxu1 %v1377_v17 }
  0x33   :  { %182 = vmatprep.subr.bf16.mxu0 %v1214_v1  ;;  %240 = vmatprep.subr.bf16.mxu1 %v1214_v1 }
  0x36   :  { %183 = vmatpush1.bf16.msra.mxu0 %v1389_v19  ;;  %241 = vmatpush1.bf16.msra.mxu1 %v1389_v19 }
  0x37   :  { %276 = vmatprep.subr.bf16.mxu0 %v1214_v1  ;;  %343 = vmatprep.subr.bf16.mxu1 %v1214_v1 }
  0x39   :  { %247 = vmatmul.mubr.bf16.vlgmr.msra.gmra.mrb[0].mxu1 %v1298_v6  ;;  %189 = vmatmul.mubr.bf16.vlgmr.msra.gmra.mrb[0].mxu0 %v1021_v8 }
  0x3a   :  { %277 = vmatpush1.bf16.msra.mxu0 %v1257_v0  ;;  %344 = vmatpush1.bf16.msra.mxu1 %v1257_v0 }
  0x3b   :  { %278 = vmatprep.subr.bf16.mxu0 %v1214_v1  ;;  %345 = vmatprep.subr.bf16.mxu1 %v1214_v1 }
  0x3c   :  { %1042 = vmatprep.mubr.msk.bf16.mxu0 %vm148_vm0, %v271_v22  ;;  %1045 = vmatprep.mubr.msk.bf16.mxu1 %vm148_vm0, %v338_v23 }
  0x3e   :  { %279 = vmatpush1.bf16.msra.mxu0 %v1266_v2  ;;  %346 = vmatpush1.bf16.msra.mxu1 %v1266_v2 }
  0x3f   :  { %280 = vmatprep.subr.bf16.mxu0 %v1214_v1  ;;  %347 = vmatprep.subr.bf16.mxu1 %v1214_v1 }
  0x42   :  { %281 = vmatpush1.bf16.msra.mxu0 %v1275_v3  ;;  %348 = vmatpush1.bf16.msra.mxu1 %v1275_v3 }
  0x43   :  { %282 = vmatprep.subr.bf16.mxu0 %v1214_v1  ;;  %349 = vmatprep.subr.bf16.mxu1 %v1214_v1 }
  0x46   :  { %283 = vmatpush1.bf16.msra.mxu0 %v1284_v4  ;;  %350 = vmatpush1.bf16.msra.mxu1 %v1284_v4 }
  0x47   :  { %284 = vmatprep.subr.bf16.mxu0 %v1214_v1  ;;  %351 = vmatprep.subr.bf16.mxu1 %v1214_v1 }
  0x4a   :  { %285 = vmatpush1.bf16.msra.mxu0 %v1291_v5  ;;  %352 = vmatpush1.bf16.msra.mxu1 %v1291_v5 }
  0x4b   :  { %286 = vmatprep.subr.bf16.mxu0 %v1214_v1  ;;  %353 = vmatprep.subr.bf16.mxu1 %v1214_v1 }
  0x4e   :  { %287 = vmatpush1.bf16.msra.mxu0 %v1310_v10  ;;  %354 = vmatpush1.bf16.msra.mxu1 %v1310_v10 }
  0x4f   :  { %288 = vmatprep.subr.bf16.mxu0 %v1214_v1  ;;  %355 = vmatprep.subr.bf16.mxu1 %v1214_v1 }
  0x52   :  { %289 = vmatpush1.bf16.msra.mxu0 %v1320_v11  ;;  %356 = vmatpush1.bf16.msra.mxu1 %v1320_v11 }
  0x53   :  { %290 = vmatprep.subr.bf16.mxu0 %v1214_v1  ;;  %357 = vmatprep.subr.bf16.mxu1 %v1214_v1 }
  0x56   :  { %291 = vmatpush1.bf16.msra.mxu0 %v1330_v12  ;;  %358 = vmatpush1.bf16.msra.mxu1 %v1330_v12 }
  0x57   :  { %292 = vmatprep.subr.bf16.mxu0 %v1214_v1  ;;  %359 = vmatprep.subr.bf16.mxu1 %v1214_v1 }
  0x5a   :  { %293 = vmatpush1.bf16.msra.mxu0 %v1341_v13  ;;  %360 = vmatpush1.bf16.msra.mxu1 %v1341_v13 }
  0x5b   :  { %294 = vmatprep.subr.bf16.mxu0 %v1214_v1  ;;  %361 = vmatprep.subr.bf16.mxu1 %v1214_v1 }
  0x5e   :  { %295 = vmatpush1.bf16.msra.mxu0 %v1350_v14  ;;  %362 = vmatpush1.bf16.msra.mxu1 %v1350_v14 }
  0x5f   :  { %296 = vmatprep.subr.bf16.mxu0 %v1214_v1  ;;  %363 = vmatprep.subr.bf16.mxu1 %v1214_v1 }
  0x62   :  { %297 = vmatpush1.bf16.msra.mxu0 %v1359_v15  ;;  %364 = vmatpush1.bf16.msra.mxu1 %v1359_v15 }
  0x63   :  { %298 = vmatprep.subr.bf16.mxu0 %v1214_v1  ;;  %365 = vmatprep.subr.bf16.mxu1 %v1214_v1 }
  0x66   :  { %299 = vmatpush1.bf16.msra.mxu0 %v1368_v16  ;;  %366 = vmatpush1.bf16.msra.mxu1 %v1368_v16 }
  0x67   :  { %300 = vmatprep.subr.bf16.mxu0 %v1214_v1  ;;  %367 = vmatprep.subr.bf16.mxu1 %v1214_v1 }
  0x6a   :  { %301 = vmatpush1.bf16.msra.mxu0 %v1377_v17  ;;  %368 = vmatpush1.bf16.msra.mxu1 %v1377_v17 }
  0x6b   :  { %302 = vmatprep.subr.bf16.mxu0 %v1214_v1  ;;  %369 = vmatprep.subr.bf16.mxu1 %v1214_v1 }
  0x6e   :  { %303 = vmatpush1.bf16.msra.mxu0 %v1389_v19  ;;  %370 = vmatpush1.bf16.msra.mxu1 %v1389_v19 }
  0x6f   :  { %467 = vmatprep.subr.bf16.mxu1 %v1214_v1  ;;  %405 = vmatprep.subr.bf16.mxu0 %v1214_v1 }
  0x71   :  { %309 = vmatmul.mubr.bf16.vlgmr.msra.gmra.mrb[4].mxu0 %v1394_v20  ;;  %376 = vmatmul.mubr.bf16.vlgmr.msra.gmra.mrb[4].mxu1 %v1399_v21 }
  0x72   :  { %468 = vmatpush1.bf16.msra.mxu1 %v1257_v0  ;;  %406 = vmatpush1.bf16.msra.mxu0 %v1257_v0  ;;  %v1176_v0 = vld [vmem:[%s1654_s2 + $0x70] sm:$0xff]  }
  0x73   :  { %469 = vmatprep.subr.bf16.mxu1 %v1214_v1  ;;  %407 = vmatprep.subr.bf16.mxu0 %v1214_v1 }
  0x74   :  { %1051 = vmatprep.mubr.msk.bf16.mxu1 %vm148_vm0, %v462_v26  ;;  %1048 = vmatprep.mubr.msk.bf16.mxu0 %vm148_vm0, %v400_v27  ;;  %vm877_vm0 = vcmask 125952  }
  0x76   :  { %470 = vmatpush1.bf16.msra.mxu1 %v1266_v2  ;;  %408 = vmatpush1.bf16.msra.mxu0 %v1266_v2 }
  0x77   :  { %471 = vmatprep.subr.bf16.mxu1 %v1214_v1  ;;  %409 = vmatprep.subr.bf16.mxu0 %v1214_v1 }
  0x7a   :  { %472 = vmatpush1.bf16.msra.mxu1 %v1275_v3  ;;  %410 = vmatpush1.bf16.msra.mxu0 %v1275_v3 }
  0x7b   :  { %473 = vmatprep.subr.bf16.mxu1 %v1214_v1  ;;  %411 = vmatprep.subr.bf16.mxu0 %v1214_v1 }
  0x7e   :  { %474 = vmatpush1.bf16.msra.mxu1 %v1284_v4  ;;  %412 = vmatpush1.bf16.msra.mxu0 %v1284_v4  ;;  %v1177_v4 = vld [vmem:[%s1654_s2 + $0x30] sm:$0xff]  }
  0x7f   :  { %475 = vmatprep.subr.bf16.mxu1 %v1214_v1  ;;  %413 = vmatprep.subr.bf16.mxu0 %v1214_v1 }
  0x82   :  { %476 = vmatpush1.bf16.msra.mxu1 %v1291_v5  ;;  %414 = vmatpush1.bf16.msra.mxu0 %v1291_v5  ;;  %v1178_v5 = vld [vmem:[%s1654_s2 + $0x88] sm:$0xff]  }
  0x83   :  { %477 = vmatprep.subr.bf16.mxu1 %v1214_v1  ;;  %415 = vmatprep.subr.bf16.mxu0 %v1214_v1 }
  0x86   :  { %478 = vmatpush1.bf16.msra.mxu1 %v1310_v10  ;;  %416 = vmatpush1.bf16.msra.mxu0 %v1310_v10 }
  0x87   :  { %479 = vmatprep.subr.bf16.mxu1 %v1214_v1  ;;  %417 = vmatprep.subr.bf16.mxu0 %v1214_v1 }
  0x8a   :  { %480 = vmatpush1.bf16.msra.mxu1 %v1320_v11  ;;  %418 = vmatpush1.bf16.msra.mxu0 %v1320_v11 }
  0x8b   :  { %481 = vmatprep.subr.bf16.mxu1 %v1214_v1  ;;  %419 = vmatprep.subr.bf16.mxu0 %v1214_v1 }
  0x8e   :  { %482 = vmatpush1.bf16.msra.mxu1 %v1330_v12  ;;  %420 = vmatpush1.bf16.msra.mxu0 %v1330_v12  ;;  %v1179_v12 = vld [vmem:[%s1654_s2 + $0x78] sm:$0xff]  }
  0x8f   :  { %483 = vmatprep.subr.bf16.mxu1 %v1214_v1  ;;  %421 = vmatprep.subr.bf16.mxu0 %v1214_v1 }
  0x92   :  { %484 = vmatpush1.bf16.msra.mxu1 %v1341_v13  ;;  %422 = vmatpush1.bf16.msra.mxu0 %v1341_v13 }
  0x93   :  { %485 = vmatprep.subr.bf16.mxu1 %v1214_v1  ;;  %423 = vmatprep.subr.bf16.mxu0 %v1214_v1 }
  0x96   :  { %486 = vmatpush1.bf16.msra.mxu1 %v1350_v14  ;;  %424 = vmatpush1.bf16.msra.mxu0 %v1350_v14 }
  0x97   :  { %487 = vmatprep.subr.bf16.mxu1 %v1214_v1  ;;  %425 = vmatprep.subr.bf16.mxu0 %v1214_v1 }
  0x9a   :  { %488 = vmatpush1.bf16.msra.mxu1 %v1359_v15  ;;  %426 = vmatpush1.bf16.msra.mxu0 %v1359_v15 }
  0x9b   :  { %489 = vmatprep.subr.bf16.mxu1 %v1214_v1  ;;  %427 = vmatprep.subr.bf16.mxu0 %v1214_v1 }
  0x9e   :  { %490 = vmatpush1.bf16.msra.mxu1 %v1368_v16  ;;  %428 = vmatpush1.bf16.msra.mxu0 %v1368_v16 }
  0x9f   :  { %491 = vmatprep.subr.bf16.mxu1 %v1214_v1  ;;  %429 = vmatprep.subr.bf16.mxu0 %v1214_v1 }
  0xa2   :  { %492 = vmatpush1.bf16.msra.mxu1 %v1377_v17  ;;  %430 = vmatpush1.bf16.msra.mxu0 %v1377_v17 }
  0xa3   :  { %493 = vmatprep.subr.bf16.mxu1 %v1214_v1  ;;  %431 = vmatprep.subr.bf16.mxu0 %v1214_v1  ;;  %v1217_v1 = vmov 0.0  }
  0xa6   :  { %494 = vmatpush1.bf16.msra.mxu1 %v1389_v19  ;;  %432 = vmatpush1.bf16.msra.mxu0 %v1389_v19 }
  0xa7   :  { %1077 = vmatprep.subr.bf16.mxu0 %v1163_v39  ;;  %1110 = vmatprep.subr.bf16.mxu1 %v1217_v1 }
  0xa9   :  { %500 = vmatmul.mubr.bf16.vlgmr.msra.gmra.mrb[8].mxu1 %v1467_v24  ;;  %438 = vmatmul.mubr.bf16.vlgmr.msra.gmra.mrb[8].mxu0 %v1472_v25 }
  0xaa   :  { %1078 = vmatpush3.bf16.msra.mxu0 %v1164_v40  ;;  %1111 = vmatpush3.bf16.msra.mxu1 %v1175_v63 }
  0xab   :  { %1079 = vmatprep.subr.bf16.mxu0 %v1165_v41  ;;  %1112 = vmatprep.subr.bf16.mxu1 %v1217_v1 }
  0xac   :  { %1114 = vmatprep.mubr.msk.bf16.mxu1 %vm1218_vm3, %v1217_v1 }
  0xae   :  { %1080 = vmatpush3.bf16.msra.mxu0 %v1166_v42  ;;  %1113 = vmatpush3.bf16.msra.mxu1 %v1178_v5 }
  0xaf   :  { %1081 = vmatprep.subr.bf16.mxu0 %v1167_v45  ;;  %1118 = vmatprep.subr.bf16.mxu1 %v1217_v1 }
  0xb2   :  { %1082 = vmatpush3.bf16.msra.mxu0 %v1168_v55 }
  0xb3   :  { %1083 = vmatprep.subr.bf16.mxu0 %v1169_v56 }
  0xb6   :  { %1084 = vmatpush3.bf16.msra.mxu0 %v1170_v58 }
  0xb7   :  { %1085 = vmatprep.subr.bf16.mxu0 %v1171_v59 }
  0xba   :  { %1086 = vmatpush3.bf16.msra.mxu0 %v1172_v60 }
  0xbb   :  { %1087 = vmatprep.subr.bf16.mxu0 %v1173_v61 }
  0xbe   :  { %1088 = vmatpush3.bf16.msra.mxu0 %v1174_v62 }
  0xbf   :  { %1089 = vmatprep.subr.bf16.mxu0 %v1176_v0 }
  0xc2   :  { %1090 = vmatpush3.bf16.msra.mxu0 %v1177_v4 }
  0xc3   :  { %1091 = vmatprep.subr.bf16.mxu0 %v1179_v12 }
  0xc6   :  { %1092 = vmatpush3.bf16.msra.mxu0 %v1180_v18 }
 0x10c   :  { %v248_v29 = vpop.f32.mrb[0].mxu1  ;;  %v190_v30 = vpop.f32.mrb[0].mxu0 }
 0x10d   :  { %v250_v31 = vpop.f32.mrb[1].mxu1  ;;  %v191_v32 = vadd.f32 %v1545_v28, %v190_v30  ;;  %v192_v33 = vpop.f32.mrb[1].mxu0  ;;  %v249_v51 = vadd.f32 %v1545_v28, %v248_v29 }
 0x10e   :  { %v251_v34 = vpop.f32.mrb[2].mxu1  ;;  %v193_v35 = vpop.f32.mrb[2].mxu0 }
 0x10f   :  { %v196_v36 = vmax.f32 %v191_v32, 0.0  ;;  %v252_v37 = vpop.f32.mrb[3].mxu1  ;;  %v194_v38 = vpop.f32.mrb[3].mxu0  ;;  %v254_v57 = vmax.f32 %v249_v51, 0.0  ;;  %v1182_v35 = vld [vmem:[%s1655_s3] sm:$0xff]  }
 0x111   :  { %198 = vst.msk [vmem:[#allocation2] sm:$0xf] %vm197_vm2, %v196_v36  ;;  %v1183_v36 = vld [vmem:[%s1655_s3 + $0x8] sm:$0xff]   ;;  %vm885_vm2 = vcmask 130048   ;;  %s1223_s3 = smov [#allocation3]  }
 0x144   :  { %v310_v43 = vpop.f32.mrb[4].mxu0  ;;  %v377_v44 = vpop.f32.mrb[4].mxu1 }
 0x145   :  { %v311_v46 = vadd.f32 %v1545_v28, %v310_v43  ;;  %v379_v47 = vpop.f32.mrb[5].mxu1  ;;  %v312_v48 = vpop.f32.mrb[5].mxu0  ;;  %v378_v13 = vadd.f32 %v1545_v28, %v377_v44 }
 0x146   :  { %v380_v49 = vpop.f32.mrb[6].mxu1  ;;  %v313_v50 = vpop.f32.mrb[6].mxu0 }
 0x147   :  { %v316_v52 = vmax.f32 %v311_v46, 0.0  ;;  %v381_v53 = vpop.f32.mrb[7].mxu1  ;;  %v314_v54 = vpop.f32.mrb[7].mxu0  ;;  %v383_v19 = vmax.f32 %v378_v13, 0.0 }
 0x149   :  { %318 = vrot.lane.b32.xlu0 %v316_v52, %s1215_s21 }
 0x14d   :  { %256 = vrot.lane.b32.xlu0 %v254_v57, %s1216_s22 }
 0x17c   :  { %v501_v2 = vpop.f32.mrb[8].mxu1  ;;  %v439_v3 = vpop.f32.mrb[8].mxu0 }
 0x17d   :  { %v502_v6 = vadd.f32 %v1545_v28, %v501_v2  ;;  %v503_v7 = vpop.f32.mrb[9].mxu1  ;;  %v440_v8 = vadd.f32 %v1545_v28, %v439_v3  ;;  %v441_v9 = vpop.f32.mrb[9].mxu0 }
 0x17e   :  { %v504_v10 = vpop.f32.mrb[10].mxu1  ;;  %v442_v11 = vpop.f32.mrb[10].mxu0 }
 0x17f   :  { %v507_v14 = vmax.f32 %v502_v6, 0.0  ;;  %v445_v15 = vmax.f32 %v440_v8, 0.0  ;;  %v505_v16 = vpop.f32.mrb[11].mxu1  ;;  %v443_v17 = vpop.f32.mrb[11].mxu0 }
 0x181   :  { %509 = vrot.lane.b32.xlu1 %v507_v14, %s1219_s17  ;;  %447 = vrot.lane.b32.xlu0 %v445_v15, %s1220_s18 }
 0x185   :  { %385 = vrot.lane.b32.xlu1 %v383_v19, %s1221_s19  ;;  %824 = vrot.lane.b32.xlu0 %v1182_v35, %s1215_s21 }
 0x189   :  { %671 = vrot.lane.b32.xlu1 %v1545_v28, %s1222_s20  ;;  %826 = vrot.lane.b32.xlu0 %v1183_v36, %s1215_s21  ;;  %s1012_s21 = sshll.u32 %s1223_s3, 4  ;;  %s1013_s21 = int_to_ptr.vmem [resolvable:$true] %s1012_s21 }
 0x18a   :  { %s1190_s25 = scalar_lea.vmem %s1013_s21, 16  ;;  %s1194_s26 = scalar_lea.vmem %s1013_s21, 32 }
 0x18b   :  { %p1191_p0 = scmp.ne.s32.totalorder %s1013_s21, %s1190_s25  ;;  %p1195_p1 = scmp.lt.s32.totalorder %s1013_s21, %s1013_s21 }
 0x18c   :  { %p1196_p2 = scmp.lt.s32.totalorder %s1194_s26, %s1190_s25 }
 0x18d   :  { %776 = vrot.lane.b32.xlu1 %v1545_v28, %s1216_s22 }
 0x18e   :  { %p1197_p3 = por %p1196_p2, %p1195_p1 }
 0x190   :  { %p1198_p4 = pnand %p1197_p3, %p1191_p0 }
 0x191   :  { %830 = vrot.lane.b32.xlu1 %v1545_v28, %s1221_s19 }
 0x1bb   :  { %v319_v20 = vpop.permute.xlu0 %318 }
 0x1bc   :  { %v320_v21 = vrot.slane %v319_v20, 4 }
 0x1be   :  { %v322_v22 = vsel %vm321_vm4, %v320_v21, %v319_v20  ;;  %vm965_vm4 = vcmask 27648  }
 0x1bf   :  { %v257_v23 = vpop.permute.xlu0 %256 }
 0x1c0   :  { %260 = vst.msk [vmem:[#allocation2] sm:$0xf] %vm259_vm7, %v257_v23  ;;  %vm1004_vm7 = vcmask 0  }
 0x1c1   :  { %327 = vst.msk [vmem:[#allocation2] sm:$0xff] %vm326_vm8, %v322_v22 }
 0x1f3   :  { %v510_v24 = vpop.permute.xlu1 %509  ;;  %v448_v26 = vpop.permute.xlu0 %447 }
 0x1f4   :  { %v511_v25 = vrot.slane %v510_v24, 4 }
 0x1f6   :  { %v513_v28 = vsel %vm512_vm12, %v511_v25, %v510_v24 }
 0x1f7   :  { %v386_v27 = vpop.permute.xlu1 %385  ;;  %v825_v51 = vpop.permute.xlu0 %824 }
 0x1f8   :  { %389 = vst.msk [vmem:[#allocation2 + $0x4] sm:$0xf] %vm388_vm11, %v386_v27 }
 0x1f9   :  { %451 = vst.msk [vmem:[#allocation2 + $0x4] sm:$0xf] %vm450_vm13, %v448_v26 }
 0x1fa   :  { %518 = vst.msk [vmem:[#allocation2 + $0x4] sm:$0xff] %vm517_vm14, %v513_v28 }
 0x1fb   :  { %v672_v43 = vpop.permute.xlu1 %671  ;;  %v827_v52 = vpop.permute.xlu0 %826 }
 0x1ff   :  { %v777_v53 = vpop.permute.xlu1 %776 }
 0x201   :  { %v520_v29 = vld [vmem:[#allocation2 + $0x8] sm:$0xf]  ;;  %v519_v30 = vld [vmem:[#allocation2] sm:$0xff] }
 0x202   :  { %v526_v31 = vpack.c.bf16 %v520_v29, %v520_v29  ;;  %v522_v32 = vcombine.high %v519_v30, %v519_v30  ;;  %v524_v34 = vpack.c.bf16 %v519_v30, %v519_v30 }
 0x203   :  { %v831_v61 = vpop.permute.xlu1 %830 }
 0x204   :  { %1115 = vmatmul.mubr.msk.bf16.vlgmr.msra.gmra.mrb[12].mxu1 %vm674_vm15, %v526_v31  ;;  %v525_v33 = vpack.c.bf16 %v522_v32, %v522_v32 }
 0x205   :  { %1122 = vmatprep.mubr.msk.bf16.mxu1 %vm1218_vm3, %v1217_v1  ;;  %1119 = vmatpush3.bf16.msra.mxu1 %v1182_v35 }
 0x206   :  { %710 = vmatprep.mubr.bf16.mxu0 %v525_v33  ;;  %1120 = vmatprep.subr.bf16.mxu1 %v1217_v1 }
 0x207   :  { %711 = vmatmul.mubr.bf16.vlgmr.msra.gmra.mrb[12].mxu0 %v524_v34 }
 0x209   :  { %1121 = vmatpush3.bf16.msra.mxu1 %v1183_v36 }
 0x20a   :  { %1126 = vmatprep.subr.bf16.mxu1 %v1217_v1 }
 0x2d7   :  { %v752_v37 = vpop.f32.mrb[12].mxu1 }
 0x2d8   :  { %v1116_v38 = vpop.f32.mrb[13].mxu1 }
 0x2d9   :  { %v755_v39 = vpop.f32.mrb[14].mxu1 }
 0x2da   :  { %v1093_v40 = vpop.f32.mrb[12].mxu0  ;;  %v1117_v41 = vpop.f32.mrb[15].mxu1 }
 0x2db   :  { %v1094_v42 = vpop.f32.mrb[13].mxu0 }
 0x2dc   :  { %v1095_v44 = vadd.f32 %v1094_v42, %v1093_v40  ;;  %v1096_v45 = vpop.f32.mrb[14].mxu0 }
 0x2dd   :  { %v1097_v46 = vpop.f32.mrb[15].mxu0 }
 0x2de   :  { %v713_v47 = vadd.f32 %v1095_v44, %v672_v43 }
 0x2e0   :  { %v753_v48 = vadd.f32 %v752_v37, %v713_v47 }
 0x2e2   :  { %v758_v49 = vmax.f32 %v753_v48, 0.0 }
 0x2e4   :  { %v759_v50 = vpack.c.bf16 %v758_v49, %v758_v49 }
 0x2e6   :  { %1123 = vmatmul.mubr.msk.bf16.vlgmr.msra.gmra.mrb[16].mxu1 %vm674_vm15, %v759_v50 }
 0x2e7   :  { %1127 = vmatpush3.bf16.msra.mxu1 %v825_v51  ;;  %1130 = vmatprep.mubr.msk.bf16.mxu1 %vm1218_vm3, %v1217_v1 }
 0x2e8   :  { %1128 = vmatprep.subr.bf16.mxu1 %v1217_v1 }
 0x2eb   :  { %1129 = vmatpush3.bf16.msra.mxu1 %v827_v52 }
 0x2ec   :  { %1134 = vmatprep.subr.mxu1 %v1217_v1 }
 0x3b9   :  { %v816_v54 = vpop.f32.mrb[16].mxu1 }
 0x3ba   :  { %v817_v55 = vadd.f32 %v816_v54, %v777_v53  ;;  %v1124_v56 = vpop.f32.mrb[17].mxu1 }
 0x3bb   :  { %v819_v57 = vpop.f32.mrb[18].mxu1 }
 0x3bc   :  { %v822_v58 = vmax.f32 %v817_v55, 0.0  ;;  %v1125_v59 = vpop.f32.mrb[19].mxu1 }
 0x3be   :  { %v823_v60 = vpack.c.bf16 %v822_v58, %v822_v58 }
 0x3c0   :  { %1131 = vmatmul.mubr.msk.bf16.vlgmr.msra.gmra.mrb[20].mxu1 %vm674_vm15, %v823_v60 }
 0x3c1   :  { %1136 = vmatprep.mubr.msk.f32.mxu1 %vm1218_vm3, %v1217_v1  ;;  %v959_v1 = vlaneseq }
 0x3c3   :  { %v960_v11 = vshrl.u32 %v959_v1, 7  ;;  %v962_v12 = vand.u32 127, %v959_v1 }
 0x3c5   :  { %vm963_vm3 = vcmp.eq.s32.totalorder %v960_v11, %v962_v12 }
 0x493   :  { %v870_v62 = vpop.f32.mrb[20].mxu1 }
 0x494   :  { %v871_v63 = vadd.f32 %v870_v62, %v831_v61  ;;  %v1132_v0 = vpop.f32.mrb[21].mxu1 }
 0x495   :  { %v873_v2 = vpop.f32.mrb[22].mxu1 }
 0x496   :  { %v1133_v3 = vpop.f32.mrb[23].mxu1  ;;  %v876_v4 = vmul.f32 %v871_v63, %v871_v63 }
 0x498   :  { %v878_v5 = vsel %vm877_vm0, %v876_v4, 0.0 }
 0x499   :  { %879 = vadd.xlane.f32.xlu0 %v878_v5 }
 0x526   :  { %v880_v6 = vpop.xlane.xlu0 %879 }
 0x527   :  { %v881_v7 = vmax.f32 %v880_v6, 1e-24 }
 0x529   :  { %1184 = vrsqrt.f32 %v881_v7 }
 0x533   :  { %v1185_v8 = vpop.eup %1184 }
 0x534   :  { %v883_v9 = vmul.f32 1.4142135, %v1185_v8 }
 0x536   :  { %v884_v10 = vmul.f32 %v883_v9, %v871_v63 }
 0x538   :  { %1135 = vmatpush3.xpose.msk.msra.mxu1 %vm885_vm2, %v884_v10  ;;  %v978_v20 = vrot.slane %v884_v10, 2 }
 0x53a   :  { %v980_v23 = vmul.f32 %v978_v20, %v884_v10 }
 0x53b   :  { %1137 = vmatmul.mubr.msk.f32.vlgmr.msra.gmra.mrb[24].mxu1 %vm885_vm2, %v884_v10 }
 0x53c   :  { %v982_v24 = vsel %vm981_vm5, %v980_v23, 0.0 }
 0x60e   :  { %v955_v13 = vpop.f32.mrb[24].mxu1 }
 0x60f   :  { %v964_v14 = vsel %vm963_vm3, -1e+30, %v955_v13  ;;  %v1138_v15 = vpop.f32.mrb[25].mxu1 }
 0x610   :  { %v966_v16 = vsel %vm965_vm4, %v964_v14, -inf }
 0x611   :  { %967 = vmax.xlane.f32.xlu1 %v966_v16 }
 0x69e   :  { %v968_v17 = vpop.xlane.xlu1 %967 }
 0x69f   :  { %v969_v18 = vsub.f32 %v964_v14, %v968_v17 }
 0x6a1   :  { %v970_v19 = vmul.f32 1.442695, %v969_v18 }
 0x6a3   :  { %1186 = vpow2.f32 %v970_v19 }
 0x6ad   :  { %v1187_v21 = vpop.eup %1186 }
 0x6ae   :  { %v972_v22 = vsel %vm965_vm4, %v1187_v21, 0.0 }
 0x6af   :  { %973 = vadd.xlane.f32.xlu0 %v972_v22 }
 0x6b3   :  { %983 = vadd.xlane.f32.xlu0 %v982_v24 }
 0x73c   :  { %v974_v25 = vpop.xlane.xlu0 %973 }
 0x73d   :  { %1188 = vlog2.f32 %v974_v25 }
 0x740   :  { %v984_v26 = vpop.xlane.xlu0 %983 }
 0x741   :  { %v993_v27 = vsel %vm992_vm6, %v984_v26, 0.0 }
 0x742   :  { %v994_v28 = vrot.slane %v993_v27, 4 }
 0x744   :  { %v995_v29 = vadd.f32 %v994_v28, %v993_v27 }
 0x746   :  { %v996_v31 = vrot.slane %v995_v29, 2 }
 0x747   :  { %v1189_v30 = vpop.eup %1188 }
 0x748   :  { %v976_v32 = vmul.f32 0.6931472, %v1189_v30  ;;  %v997_v34 = vadd.f32 %v996_v31, %v995_v29 }
 0x74a   :  { %v977_v33 = vadd.f32 %v976_v32, %v968_v17  ;;  %v998_v38 = vrot.slane %v997_v34, 1 }
 0x74c   :  { %v985_v35 = vsel %vm152_vm1, %v977_v33, 0.0  ;;  %v999_v40 = vadd.f32 %v998_v38, %v997_v34 }
 0x74d   :  { %v986_v36 = vrot.slane %v985_v35, 4 }
 0x74e   :  { %v1000_v43 = vmul.f32 2.0, %v999_v40 }
 0x74f   :  { %v987_v37 = vadd.f32 %v986_v36, %v985_v35 }
 0x751   :  { %v988_v39 = vrot.slane %v987_v37, 2 }
 0x753   :  { %v989_v41 = vadd.f32 %v988_v39, %v987_v37 }
 0x755   :  { %v990_v42 = vrot.slane %v989_v41, 1 }
 0x757   :  { %v991_v44 = vadd.f32 %v990_v42, %v989_v41 }
 0x759   :  { %v1001_v45 = vsub.f32 %v991_v44, %v1000_v43 }
 0x75b   :  { %v1003_v46 = vmul.f32 0.25, %v1001_v45 }
 0x75d   :  { %1005 = vst.msk [vmem:[#allocation3] sm:$0x1] %vm1004_vm7, %v1003_v46 }
 0x75e   :  { %1201 = shalt.err (!%p1198_p4)
}
 0x75f   :  { %s1202_s1 = scalar_lea.hbm %s1657_s5, 16 }
 0x760   :  { %p1203_p5 = scmp.ne.s32.totalorder %s1657_s5, %s1202_s1  ;;  %p1206_p6 = scmp.lt.u32.totalorder %s1202_s1, %s1657_s5 }
 0x762   :  { %p1208_p7 = pnand %p1206_p6, %p1203_p5 }
 0x764   :  { %1211 = shalt.err (!%p1208_p7)
}
 0x765   :  { %1015 = dma.vmem_to_hbm [thread:$0]  %s1013_s21, 16, %s1657_s5, [#allocation4]  }
 0x766   :  { %1212 = dma.done.wait [#allocation4], 16  }
 0x767   :  { %1213 = vsyncadd [#allocation4], 4294967280 }
 0x768   :  { %1019 = vsyncpa [#allocation4], 1 }

</bundles_post_ra>
